<compile_context>
chip_gen: v6e
topology: v6e:2x2x1
jax: 0.10.0
libtpu: 0.0.40
codegen_flags: <defaults>
</compile_context>

<pallas_src>
import math

import jax
import jax.numpy as jnp
from jax import lax
from jax.experimental import pallas as pl
from jax.experimental.pallas import tpu as pltpu


def _round_up(x: int, m: int) -> int:
    return ((x + m - 1) // m) * m


def _nbytes(a) -> int:
    return int(a.size) * jnp.dtype(a.dtype).itemsize


def _pad2d(a, rows, cols):
    pr = rows - a.shape[0]
    pc = cols - a.shape[1]
    if pr == 0 and pc == 0:
        return a
    return jnp.pad(a, ((0, pr), (0, pc)))


def _contrastive_head_kernel(x_ref, w1_ref, b1_ref, w2_ref, b2_ref, o_ref):
    """Fused: L2_normalize(gelu(x @ W1 + b1) @ W2 + b2) along the last dim."""
    # dense: (tm, Hp) @ (Hp, Hp) -> f32 accumulate, + f32 bias
    h = jnp.dot(x_ref[...], w1_ref[...],
                preferred_element_type=jnp.float32) + b1_ref[...]

    # exact (erf) GELU -- matches torch.nn.functional.gelu default
    inv_sqrt2 = jnp.float32(1.0 / math.sqrt(2.0))
    h = 0.5 * h * (1.0 + lax.erf(h * inv_sqrt2))

    # out_proj: (tm, Hp) @ (Hp, Pp) -> f32 accumulate, + f32 bias
    y = jnp.dot(h.astype(w2_ref.dtype), w2_ref[...],
                preferred_element_type=jnp.float32) + b2_ref[...]

    # F.normalize(p=2, dim=-1): y / max(||y||_2, eps) with eps=1e-12.
    # rsqrt(max(sumsq, eps^2)) == 1 / max(||y||, eps); rsqrt lands on the EUP
    # slot instead of a full-width VALU divide.
    sumsq = jnp.sum(y * y, axis=-1, keepdims=True)
    inv_norm = lax.rsqrt(jnp.maximum(sumsq, jnp.float32(1e-24)))
    o_ref[...] = (y * inv_norm).astype(o_ref.dtype)


def _build_head_call(n_pad, h_pad, p_pad, tm, out_dtype, *,
                     single_buffer_weights, vmem_limit_bytes, cost):
    def const_spec(shape):
        if single_buffer_weights:
            # Weight/bias blocks never change across the grid: a single VMEM
            # buffer suffices, halving their footprint vs default 2x buffering.
            return pl.BlockSpec(shape, lambda i: (0, 0),
                                pipeline_mode=pl.Buffered(1))
        return pl.BlockSpec(shape, lambda i: (0, 0))

    return pl.pallas_call(
        _contrastive_head_kernel,
        out_shape=jax.ShapeDtypeStruct((n_pad, p_pad), out_dtype),
        grid_spec=pltpu.PrefetchScalarGridSpec(
            num_scalar_prefetch=0,
            grid=(n_pad // tm,),
            in_specs=[
                pl.BlockSpec((tm, h_pad), lambda i: (i, 0)),   # x row tile
                const_spec((h_pad, h_pad)),                    # W1 (grid-invariant)
                const_spec((1, h_pad)),                        # b1
                const_spec((h_pad, p_pad)),                    # W2 (grid-invariant)
                const_spec((1, p_pad)),                        # b2
            ],
            out_specs=pl.BlockSpec((tm, p_pad), lambda i: (i, 0)),
        ),
        compiler_params=pltpu.CompilerParams(
            dimension_semantics=("parallel",),   # row tiles are independent
            vmem_limit_bytes=vmem_limit_bytes,
        ),
        cost_estimate=cost,
    )


def contrastive_head_pallas(x2d, w1, b1, w2, b2, *, tm=256, mxu_dtype=None):
    """x2d: (N, H). w1: (H, H) pre-transposed (kernel does x @ W1). b1: (1, H).
    w2: (H, P) pre-transposed. b2: (1, P).

    tm: row tile (sweep 128/256/512 for large N).
    mxu_dtype: dtype fed to the MXU (e.g. jnp.bfloat16 on v6e/v7x); the
    accumulation, biases and output stay f32.
    """
    n, hidden = x2d.shape
    proj = w2.shape[1]
    out_dtype = x2d.dtype
    compute_dtype = jnp.dtype(mxu_dtype) if mxu_dtype is not None else jnp.dtype(x2d.dtype)

    # Lane-dense padding (exact: zero rows/cols contribute nothing to matmuls,
    # GELU(0)=0, and zero lanes add nothing to the L2 norm).
    h_pad = _round_up(hidden, 128)
    p_pad = _round_up(proj, 128)
    tm_eff = min(_round_up(tm, 8), _round_up(n, 8))
    n_pad = _round_up(n, tm_eff)

    x_p = _pad2d(x2d, n_pad, h_pad).astype(compute_dtype)
    w1_p = _pad2d(w1, h_pad, h_pad).astype(compute_dtype)
    w2_p = _pad2d(w2, h_pad, p_pad).astype(compute_dtype)
    b1_p = _pad2d(b1, 1, h_pad).astype(jnp.float32)
    b2_p = _pad2d(b2, 1, p_pad).astype(jnp.float32)

    # Cost hint so XLA can schedule the head against surrounding (base-model) ops.
    flops = 2 * n_pad * h_pad * (h_pad + p_pad)
    bytes_accessed = (_nbytes(x_p) + _nbytes(w1_p) + _nbytes(w2_p)
                      + _nbytes(b1_p) + _nbytes(b2_p)
                      + n_pad * p_pad * jnp.dtype(out_dtype).itemsize)
    cost = pl.CostEstimate(flops=flops,
                           transcendentals=n_pad * h_pad,   # erf (+ rsqrt, negligible)
                           bytes_accessed=int(bytes_accessed))

    # VMEM budget: weights/biases + double-buffered x/out tiles + f32
    # intermediates; clamp to [32 MiB, 64 MiB] which is valid on every
    # generation (v7x has 64 MiB per TensorCore).
    cbytes = jnp.dtype(compute_dtype).itemsize
    obytes = jnp.dtype(out_dtype).itemsize
    weight_bytes = (h_pad * h_pad + h_pad * p_pad) * cbytes + (h_pad + p_pad) * 4
    tile_bytes = tm_eff * (h_pad * cbytes + h_pad * 4 + p_pad * 4 + p_pad * obytes)
    vmem_limit = int(min(max(2 * weight_bytes + 2 * tile_bytes + (8 << 20),
                             32 << 20), 64 << 20))
    # TODO(synk): for very large H (e.g. H>=4096 in f32) full-resident weights
    # exceed v7x's 64 MiB VMEM; use bf16 weights and/or a K-tiled accumulator
    # grid axis (f32 VMEM scratch, axis marked "arbitrary") in that regime.

    args = (x_p, w1_p, b1_p, w2_p, b2_p)
    try:
        out = _build_head_call(n_pad, h_pad, p_pad, tm_eff, out_dtype,
                               single_buffer_weights=True,
                               vmem_limit_bytes=vmem_limit, cost=cost)(*args)
        out = jax.block_until_ready(out)
    except Exception:
        # Fallback: default double-buffering (in case pl.Buffered(1) is not
        # supported by the installed Pallas at the top-level pipeline).
        out = _build_head_call(n_pad, h_pad, p_pad, tm_eff, out_dtype,
                               single_buffer_weights=False,
                               vmem_limit_bytes=vmem_limit, cost=cost)(*args)

    return out[:n, :proj]


def contrastive_model_forward(hidden_states, lm_logits, params,
                              classification_head_name="contrast",
                              *, tm=256, mxu_dtype=None):
    """Mirrors ContrastiveModel.forward's output contract: (lm_logits, contrast_output)."""
    # TODO(synk): the base transformer (PreTrainedModel) itself is external to
    # this module; hidden_states / lm_logits are taken as inputs rather than
    # recomputed (LoRA wrapping / logging side effects are likewise external).
    contrast_output = None
    if classification_head_name == "contrast":
        B, T, H = hidden_states.shape
        hidden_2d = hidden_states.reshape(B * T, H)
        projected_2d = contrastive_head_pallas(
            hidden_2d,
            params["dense_w_t"], params["dense_b"],
            params["out_proj_w_t"], params["out_proj_b"],
            tm=tm, mxu_dtype=mxu_dtype,
        )
        P = projected_2d.shape[-1]
        contrast_output = projected_2d.reshape(B, T, P)
    return lm_logits, contrast_output


def init_contrastive_head_params(key, hidden_size, projection_size):
    """Matches ContrastiveHead.__init__ initialization (deterministic via PRNGKey)."""
    k1, k2 = jax.random.split(key)
    # dense: Linear(H, H), weight ~ N(0, 0.01), bias = 0   (torch weight is (out,in))
    dense_w = 0.01 * jax.random.normal(k1, (hidden_size, hidden_size), jnp.float32)
    dense_b = jnp.zeros((1, hidden_size), jnp.float32)
    # out_proj: Linear(H, P), weight ~ N(0, 1/H), bias = 0
    out_w = (1.0 / hidden_size) * jax.random.normal(
        k2, (projection_size, hidden_size), jnp.float32)
    out_b = jnp.zeros((1, projection_size), jnp.float32)
    return {
        "dense_w_t": dense_w.T,      # pre-transpose: kernel does x @ W
        "dense_b": dense_b,
        "out_proj_w_t": out_w.T,
        "out_proj_b": out_b,
    }


if __name__ == "__main__":
    # Small shapes consistent with the module: batch=2, seq=8, hidden=32, proj=16, vocab=64
    B, T, H, P, V = 2, 8, 32, 16, 64

    key = jax.random.PRNGKey(0)
    k_hidden, k_logits, k_params = jax.random.split(key, 3)

    hidden_states = jax.random.normal(k_hidden, (B, T, H), jnp.float32)
    lm_logits = jax.random.normal(k_logits, (B, T, V), jnp.float32)  # stands in for base_model logits
    params = init_contrastive_head_params(k_params, H, P)

    # Reference (plain JAX) for the ContrastiveHead.
    def ref_head(x2d):
        h = x2d @ params["dense_w_t"] + params["dense_b"]
        h = 0.5 * h * (1.0 + jax.lax.erf(h / jnp.sqrt(jnp.float32(2.0))))
        y = h @ params["out_proj_w_t"] + params["out_proj_b"]
        nrm = jnp.sqrt(jnp.sum(y * y, axis=-1, keepdims=True))
        return y / jnp.maximum(nrm, 1e-12)

    expected = ref_head(hidden_states.reshape(B * T, H)).reshape(B, T, P)

    # f32 MXU path (faithful to the PyTorch module's default dtype).
    lm_out, contrast_out = contrastive_model_forward(
        hidden_states, lm_logits, params, classification_head_name="contrast")
    contrast_out = jax.block_until_ready(contrast_out)
    lm_out = jax.block_until_ready(lm_out)
    assert lm_out.shape == (B, T, V)
    assert contrast_out.shape == (B, T, P)
    assert jnp.allclose(contrast_out, expected, atol=3e-5, rtol=3e-5)

    # bf16 MXU path (recommended on v6e/v7x: ~2x matmul throughput, half the
    # weight DMA); tolerance loosened accordingly.
    _, contrast_bf16 = contrastive_model_forward(
        hidden_states, lm_logits, params, classification_head_name="contrast",
        mxu_dtype=jnp.bfloat16)
    contrast_bf16 = jax.block_until_ready(contrast_bf16)
    assert contrast_bf16.shape == (B, T, P)
    assert jnp.allclose(contrast_bf16, expected, atol=5e-2, rtol=5e-2)

    print("KERNEL_OK")
</pallas_src>

<mosaic_0001>
module attributes {stable_mosaic.version = 11 : i64} {
  func.func @_contrastive_head_kernel(%arg0: i32, %arg1: memref<16x128xf32, #tpu.memory_space<vmem>>, %arg2: memref<128x128xf32, #tpu.memory_space<vmem>>, %arg3: memref<1x128xf32, #tpu.memory_space<vmem>>, %arg4: memref<128x128xf32, #tpu.memory_space<vmem>>, %arg5: memref<1x128xf32, #tpu.memory_space<vmem>>, %arg6: memref<16x128xf32, #tpu.memory_space<vmem>>) attributes {dimension_semantics = [#tpu.dimension_semantics<parallel>], iteration_bounds = array<i64: 1>, scalar_prefetch = 0 : i64, scratch_operands = 0 : i64, tpu.core_type = #tpu.core_type<tc>, window_params = [{transform_indices = @transform_0, window_bounds = array<i64: 16, 128>}, {pipeline_mode = #tpu.pipeline_mode<synchronous>, transform_indices = @transform_1, window_bounds = array<i64: 128, 128>}, {pipeline_mode = #tpu.pipeline_mode<synchronous>, transform_indices = @transform_2, window_bounds = array<i64: 1, 128>}, {pipeline_mode = #tpu.pipeline_mode<synchronous>, transform_indices = @transform_3, window_bounds = array<i64: 128, 128>}, {pipeline_mode = #tpu.pipeline_mode<synchronous>, transform_indices = @transform_4, window_bounds = array<i64: 1, 128>}, {transform_indices = @transform_5, window_bounds = array<i64: 16, 128>}]} {
    %c0 = arith.constant 0 : index
    %c0_0 = arith.constant 0 : index
    %0 = vector.load %arg1[%c0, %c0_0] : memref<16x128xf32, #tpu.memory_space<vmem>>, vector<16x128xf32>
    %c0_1 = arith.constant 0 : index
    %c0_2 = arith.constant 0 : index
    %1 = vector.load %arg2[%c0_1, %c0_2] : memref<128x128xf32, #tpu.memory_space<vmem>>, vector<128x128xf32>
    %cst = arith.constant dense<0.000000e+00> : vector<16x128xf32>
    %2 = tpu.matmul %0, %1, %cst {dimension_numbers = #tpu.dot_dimension_numbers<[1], [0], [0], [1], [0, 0, 1, 1], [], []>} : vector<16x128xf32>, vector<128x128xf32>, vector<16x128xf32> -> vector<16x128xf32>
    %c0_3 = arith.constant 0 : index
    %c0_4 = arith.constant 0 : index
    %3 = vector.load %arg3[%c0_3, %c0_4] : memref<1x128xf32, #tpu.memory_space<vmem>>, vector<1x128xf32>
    %4 = vector.broadcast %3 : vector<1x128xf32> to vector<16x128xf32>
    %5 = arith.addf %2, %4 : vector<16x128xf32>
    %cst_5 = arith.constant 5.000000e-01 : f32
    %6 = vector.broadcast %cst_5 : f32 to vector<16x128xf32>
    %7 = arith.mulf %6, %5 : vector<16x128xf32>
    %cst_6 = arith.constant 0.707106769 : f32
    %8 = vector.broadcast %cst_6 : f32 to vector<16x128xf32>
    %9 = arith.mulf %5, %8 : vector<16x128xf32>
    %10 = math.erf %9 : vector<16x128xf32>
    %cst_7 = arith.constant 1.000000e+00 : f32
    %11 = vector.broadcast %cst_7 : f32 to vector<16x128xf32>
    %12 = arith.addf %11, %10 : vector<16x128xf32>
    %13 = arith.mulf %7, %12 : vector<16x128xf32>
    %c0_8 = arith.constant 0 : index
    %c0_9 = arith.constant 0 : index
    %14 = vector.load %arg4[%c0_8, %c0_9] : memref<128x128xf32, #tpu.memory_space<vmem>>, vector<128x128xf32>
    %cst_10 = arith.constant dense<0.000000e+00> : vector<16x128xf32>
    %15 = tpu.matmul %13, %14, %cst_10 {dimension_numbers = #tpu.dot_dimension_numbers<[1], [0], [0], [1], [0, 0, 1, 1], [], []>} : vector<16x128xf32>, vector<128x128xf32>, vector<16x128xf32> -> vector<16x128xf32>
    %c0_11 = arith.constant 0 : index
    %c0_12 = arith.constant 0 : index
    %16 = vector.load %arg5[%c0_11, %c0_12] : memref<1x128xf32, #tpu.memory_space<vmem>>, vector<1x128xf32>
    %17 = vector.broadcast %16 : vector<1x128xf32> to vector<16x128xf32>
    %18 = arith.addf %15, %17 : vector<16x128xf32>
    %19 = arith.mulf %18, %18 : vector<16x128xf32>
    %cst_13 = arith.constant dense<0.000000e+00> : vector<16xf32>
    %20 = vector.multi_reduction <add>, %19, %cst_13 [1] : vector<16x128xf32> to vector<16xf32>
    %21 = vector.shape_cast %20 : vector<16xf32> to vector<16x1xf32>
    %cst_14 = arith.constant 1.000000e-24 : f32
    %22 = vector.broadcast %cst_14 : f32 to vector<16x1xf32>
    %23 = arith.maximumf %21, %22 : vector<16x1xf32>
    %24 = math.rsqrt %23 : vector<16x1xf32>
    %25 = vector.broadcast %24 : vector<16x1xf32> to vector<16x128xf32>
    %26 = arith.mulf %18, %25 : vector<16x128xf32>
    %c0_15 = arith.constant 0 : index
    %c0_16 = arith.constant 0 : index
    %27 = vector.load %arg6[%c0_15, %c0_16] : memref<16x128xf32, #tpu.memory_space<vmem>>, vector<16x128xf32>
    tpu.vector_store %arg6[%c0_15, %c0_16], %26 {strides = array<i32>} : memref<16x128xf32, #tpu.memory_space<vmem>>, vector<16x128xf32>,
    return
  }
  func.func @transform_0(%arg0: i32) -> (i32, i32) {
    %c0_i32 = arith.constant 0 : i32
    %c0_i32_0 = arith.constant 0 : i32
    return %arg0, %c0_i32 : i32, i32
  }
  func.func @transform_1(%arg0: i32) -> (i32, i32) {
    %c0_i32 = arith.constant 0 : i32
    %c0_i32_0 = arith.constant 0 : i32
    %c0_i32_1 = arith.constant 0 : i32
    return %c0_i32, %c0_i32_0 : i32, i32
  }
  func.func @transform_2(%arg0: i32) -> (i32, i32) {
    %c0_i32 = arith.constant 0 : i32
    %c0_i32_0 = arith.constant 0 : i32
    %c0_i32_1 = arith.constant 0 : i32
    return %c0_i32, %c0_i32_0 : i32, i32
  }
  func.func @transform_3(%arg0: i32) -> (i32, i32) {
    %c0_i32 = arith.constant 0 : i32
    %c0_i32_0 = arith.constant 0 : i32
    %c0_i32_1 = arith.constant 0 : i32
    return %c0_i32, %c0_i32_0 : i32, i32
  }
  func.func @transform_4(%arg0: i32) -> (i32, i32) {
    %c0_i32 = arith.constant 0 : i32
    %c0_i32_0 = arith.constant 0 : i32
    %c0_i32_1 = arith.constant 0 : i32
    return %c0_i32, %c0_i32_0 : i32, i32
  }
  func.func @transform_5(%arg0: i32) -> (i32, i32) {
    %c0_i32 = arith.constant 0 : i32
    %c0_i32_0 = arith.constant 0 : i32
    return %arg0, %c0_i32 : i32, i32
  }
}

module attributes {stable_mosaic.version = 11 : i64} {
  func.func @_contrastive_head_kernel(%arg0: i32, %arg1: memref<16x128xf32, #tpu.memory_space<vmem>>, %arg2: memref<128x128xf32, #tpu.memory_space<vmem>>, %arg3: memref<1x128xf32, #tpu.memory_space<vmem>>, %arg4: memref<128x128xf32, #tpu.memory_space<vmem>>, %arg5: memref<1x128xf32, #tpu.memory_space<vmem>>, %arg6: memref<16x128xf32, #tpu.memory_space<vmem>>) attributes {dimension_semantics = [#tpu.dimension_semantics<parallel>], iteration_bounds = array<i64: 1>, scalar_prefetch = 0 : i64, scratch_operands = 0 : i64, tpu.core_type = #tpu.core_type<tc>, window_params = [{transform_indices = @transform_0, window_bounds = array<i64: 16, 128>}, {pipeline_mode = #tpu.pipeline_mode<synchronous>, transform_indices = @transform_1, window_bounds = array<i64: 128, 128>}, {pipeline_mode = #tpu.pipeline_mode<synchronous>, transform_indices = @transform_2, window_bounds = array<i64: 1, 128>}, {pipeline_mode = #tpu.pipeline_mode<synchronous>, transform_indices = @transform_3, window_bounds = array<i64: 128, 128>}, {pipeline_mode = #tpu.pipeline_mode<synchronous>, transform_indices = @transform_4, window_bounds = array<i64: 1, 128>}, {transform_indices = @transform_5, window_bounds = array<i64: 16, 128>}]} {
    %c0 = arith.constant 0 : index
    %c0_0 = arith.constant 0 : index
    %0 = vector.load %arg1[%c0, %c0_0] : memref<16x128xf32, #tpu.memory_space<vmem>>, vector<16x128xf32>
    %c0_1 = arith.constant 0 : index
    %c0_2 = arith.constant 0 : index
    %1 = vector.load %arg2[%c0_1, %c0_2] : memref<128x128xf32, #tpu.memory_space<vmem>>, vector<128x128xf32>
    %cst = arith.constant dense<0.000000e+00> : vector<16x128xf32>
    %2 = tpu.matmul %0, %1, %cst {dimension_numbers = #tpu.dot_dimension_numbers<[1], [0], [0], [1], [0, 0, 1, 1], [], []>} : vector<16x128xf32>, vector<128x128xf32>, vector<16x128xf32> -> vector<16x128xf32>
    %c0_3 = arith.constant 0 : index
    %c0_4 = arith.constant 0 : index
    %3 = vector.load %arg3[%c0_3, %c0_4] : memref<1x128xf32, #tpu.memory_space<vmem>>, vector<1x128xf32>
    %4 = vector.broadcast %3 : vector<1x128xf32> to vector<16x128xf32>
    %5 = arith.addf %2, %4 : vector<16x128xf32>
    %cst_5 = arith.constant 5.000000e-01 : f32
    %6 = vector.broadcast %cst_5 : f32 to vector<16x128xf32>
    %7 = arith.mulf %6, %5 : vector<16x128xf32>
    %cst_6 = arith.constant 0.707106769 : f32
    %8 = vector.broadcast %cst_6 : f32 to vector<16x128xf32>
    %9 = arith.mulf %5, %8 : vector<16x128xf32>
    %10 = math.erf %9 : vector<16x128xf32>
    %cst_7 = arith.constant 1.000000e+00 : f32
    %11 = vector.broadcast %cst_7 : f32 to vector<16x128xf32>
    %12 = arith.addf %11, %10 : vector<16x128xf32>
    %13 = arith.mulf %7, %12 : vector<16x128xf32>
    %c0_8 = arith.constant 0 : index
    %c0_9 = arith.constant 0 : index
    %14 = vector.load %arg4[%c0_8, %c0_9] : memref<128x128xf32, #tpu.memory_space<vmem>>, vector<128x128xf32>
    %cst_10 = arith.constant dense<0.000000e+00> : vector<16x128xf32>
    %15 = tpu.matmul %13, %14, %cst_10 {dimension_numbers = #tpu.dot_dimension_numbers<[1], [0], [0], [1], [0, 0, 1, 1], [], []>} : vector<16x128xf32>, vector<128x128xf32>, vector<16x128xf32> -> vector<16x128xf32>
    %c0_11 = arith.constant 0 : index
    %c0_12 = arith.constant 0 : index
    %16 = vector.load %arg5[%c0_11, %c0_12] : memref<1x128xf32, #tpu.memory_space<vmem>>, vector<1x128xf32>
    %17 = vector.broadcast %16 : vector<1x128xf32> to vector<16x128xf32>
    %18 = arith.addf %15, %17 : vector<16x128xf32>
    %19 = arith.mulf %18, %18 : vector<16x128xf32>
    %cst_13 = arith.constant dense<0.000000e+00> : vector<16xf32>
    %20 = vector.multi_reduction <add>, %19, %cst_13 [1] : vector<16x128xf32> to vector<16xf32>
    %21 = vector.shape_cast %20 : vector<16xf32> to vector<16x1xf32>
    %cst_14 = arith.constant 1.000000e-24 : f32
    %22 = vector.broadcast %cst_14 : f32 to vector<16x1xf32>
    %23 = arith.maximumf %21, %22 : vector<16x1xf32>
    %24 = math.rsqrt %23 : vector<16x1xf32>
    %25 = vector.broadcast %24 : vector<16x1xf32> to vector<16x128xf32>
    %26 = arith.mulf %18, %25 : vector<16x128xf32>
    %c0_15 = arith.constant 0 : index
    %c0_16 = arith.constant 0 : index
    %27 = vector.load %arg6[%c0_15, %c0_16] : memref<16x128xf32, #tpu.memory_space<vmem>>, vector<16x128xf32>
    tpu.vector_store %arg6[%c0_15, %c0_16], %26 {strides = array<i32>} : memref<16x128xf32, #tpu.memory_space<vmem>>, vector<16x128xf32>,
    return
  }
  func.func @transform_0(%arg0: i32) -> (i32, i32) {
    %c0_i32 = arith.constant 0 : i32
    %c0_i32_0 = arith.constant 0 : i32
    return %arg0, %c0_i32 : i32, i32
  }
  func.func @transform_1(%arg0: i32) -> (i32, i32) {
    %c0_i32 = arith.constant 0 : i32
    %c0_i32_0 = arith.constant 0 : i32
    %c0_i32_1 = arith.constant 0 : i32
    return %c0_i32, %c0_i32_0 : i32, i32
  }
  func.func @transform_2(%arg0: i32) -> (i32, i32) {
    %c0_i32 = arith.constant 0 : i32
    %c0_i32_0 = arith.constant 0 : i32
    %c0_i32_1 = arith.constant 0 : i32
    return %c0_i32, %c0_i32_0 : i32, i32
  }
  func.func @transform_3(%arg0: i32) -> (i32, i32) {
    %c0_i32 = arith.constant 0 : i32
    %c0_i32_0 = arith.constant 0 : i32
    %c0_i32_1 = arith.constant 0 : i32
    return %c0_i32, %c0_i32_0 : i32, i32
  }
  func.func @transform_4(%arg0: i32) -> (i32, i32) {
    %c0_i32 = arith.constant 0 : i32
    %c0_i32_0 = arith.constant 0 : i32
    %c0_i32_1 = arith.constant 0 : i32
    return %c0_i32, %c0_i32_0 : i32, i32
  }
  func.func @transform_5(%arg0: i32) -> (i32, i32) {
    %c0_i32 = arith.constant 0 : i32
    %c0_i32_0 = arith.constant 0 : i32
    return %arg0, %c0_i32 : i32, i32
  }
}

</mosaic_0001>

<bundles_post_ra>
// kernel: tpu_custom_call.1
= control target key start
LH: loop header
LB: loop body
LE: loop exit
PB: predicated region body
PF: predicated region fallthrough
CT: control target
= control target key end

     0   :  { %10 = vsyncpa [#allocation3], 0  ;;  %s576_s0 = inlined_call_operand.hbm [shape: f32[16,128], index: 0, kind: input, shape index: {}]   ;;  %s577_s1 = inlined_call_operand.hbm [shape: f32[128,128], index: 1, kind: input, shape index: {}]   ;;  %s578_s2 = inlined_call_operand.vmem [shape: f32[1,128], index: 2, kind: input, shape index: {}]   ;;  %s579_s3 = inlined_call_operand.hbm [shape: f32[128,128], index: 3, kind: input, shape index: {}]   ;;  %s580_s4 = inlined_call_operand.vmem [shape: f32[1,128], index: 4, kind: input, shape index: {}]   ;;  %s581_s5 = inlined_call_operand.hbm [shape: f32[16,128], index: 5, kind: output, shape index: {}]  }
   0x1   :  { %11 = vsyncpa [#allocation6], 0 }
   0x2   :  { %12 = vsyncpa [#allocation4], 0  ;;  %s510_s18 = smov [#allocation5]   ;;  %s511_s20 = smov [#allocation2]  }
   0x3   :  { %s30_s19 = sshll.u32 %s510_s18, 4  ;;  %s18_s21 = sshll.u32 %s511_s20, 4  ;;  %s31_s19 = int_to_ptr.vmem [resolvable:$true] %s30_s19  ;;  %s19_s21 = int_to_ptr.vmem [resolvable:$true] %s18_s21 }
   0x4   :  { %s432_s22 = scalar_lea.vmem %s31_s19, 2048  ;;  %p437_p1 = scmp.lt.s32.totalorder %s31_s19, %s31_s19 }
   0x5   :  { %p433_p0 = scmp.ne.s32.totalorder %s31_s19, %s432_s22  ;;  %p438_p2 = scmp.lt.s32.totalorder %s432_s22, %s432_s22 }
   0x7   :  { %p439_p3 = por %p438_p2, %p437_p1 }
   0x9   :  { %p440_p4 = pnand %p439_p3, %p433_p0 }
   0xb   :  { %443 = shalt.err (!%p440_p4)
}
   0xc   :  { %s512_s23 = smov 128   ;;  %s513_s24 = smov 8  }
   0xd   :  { %36 = dma.hbm_to_vmem [thread:$0]  %s577_s1, 2048, %s31_s19, [#allocation6], %s512_s23, %s512_s23, %s513_s24  }
   0xe   :  { %s452_s27 = scalar_lea.vmem %s19_s21, 256  ;;  %p457_p6 = scmp.lt.s32.totalorder %s19_s21, %s19_s21 }
   0xf   :  { %p453_p5 = scmp.ne.s32.totalorder %s19_s21, %s452_s27  ;;  %p458_p7 = scmp.lt.s32.totalorder %s452_s27, %s452_s27 }
  0x11   :  { %p459_p8 = por %p458_p7, %p457_p6 }
  0x13   :  { %p460_p9 = pnand %p459_p8, %p453_p5 }
  0x15   :  { %463 = shalt.err (!%p460_p9)
}
  0x16   :  { %24 = dma.hbm_to_vmem [thread:$0]  %s576_s0, 256, %s19_s21, [#allocation3], %s512_s23, %s512_s23, %s513_s24  }
  0x17   :  { %s514_s30 = smov [#allocation7]  }
  0x18   :  { %s44_s6 = sshll.u32 %s514_s30, 4  ;;  %s45_s6 = int_to_ptr.vmem [resolvable:$true] %s44_s6 }
  0x19   :  { %s472_s7 = scalar_lea.vmem %s45_s6, 2048  ;;  %p477_p11 = scmp.lt.s32.totalorder %s45_s6, %s45_s6 }
  0x1a   :  { %p473_p10 = scmp.ne.s32.totalorder %s45_s6, %s472_s7  ;;  %p478_p12 = scmp.lt.s32.totalorder %s472_s7, %s472_s7 }
  0x1c   :  { %p479_p13 = por %p478_p12, %p477_p11 }
  0x1e   :  { %p480_p0 = pnand %p479_p13, %p473_p10 }
  0x20   :  { %483 = shalt.err (!%p480_p0)
}
  0x21   :  { %50 = dma.hbm_to_vmem [thread:$0]  %s579_s3, 2048, %s45_s6, [#allocation6], %s512_s23, %s512_s23, %s513_s24  }
  0x22   :  { %504 = dma.done.wait [#allocation3], 256  }
  0x23   :  { %505 = vsyncadd [#allocation3], 4294967040 }
  0x24   :  { %506 = dma.done.wait [#allocation6], 4096  }
  0x25   :  { %507 = vsyncadd [#allocation6], 4294963200  ;;  %v79_v0 = vld [vmem:[#allocation5 + $0x78] sm:$0xff]  ;;  %v78_v1 = vld [vmem:[#allocation5 + $0x70] sm:$0xff]  ;;  %s515_s10 = smov [#allocation8]  }
  0x26   :  { %340 = vmatprep.subr.mxu0 %v79_v0  ;;  %v77_v2 = vld [vmem:[#allocation5 + $0x68] sm:$0xff]  ;;  %v76_v3 = vld [vmem:[#allocation5 + $0x60] sm:$0xff]  ;;  %v62_v4 = vld [vmem:[#allocation2] sm:$0xff]  ;;  %s289_s11 = sshll.u32 %s515_s10, 4  ;;  %s290_s11 = int_to_ptr.vmem [resolvable:$true] %s289_s11 }
  0x27   :  { %341 = vmatpush3.msra.mxu0 %v79_v0  ;;  %v75_v5 = vld [vmem:[#allocation5 + $0x58] sm:$0xff]  ;;  %372 = vmatprep.mubr.f32.mxu0 %v62_v4  ;;  %v186_v7 = vld [vmem:[#allocation7 + $0x70] sm:$0xff]  ;;  %v185_v9 = vld [vmem:[#allocation7 + $0x68] sm:$0xff]  ;;  %p489_p2 = scmp.lt.s32.totalorder %s290_s11, %s290_s11 }
  0x28   :  { %342 = vmatprep.subr.mxu0 %v78_v1  ;;  %v187_v6 = vld [vmem:[#allocation7 + $0x78] sm:$0xff]  ;;  %v74_v8 = vld [vmem:[#allocation5 + $0x50] sm:$0xff]  ;;  %v73_v10 = vld [vmem:[#allocation5 + $0x48] sm:$0xff] }
  0x29   :  { %343 = vmatpush3.msra.mxu0 %v78_v1  ;;  %375 = vmatprep.subr.mxu1 %v187_v6  ;;  %v72_v11 = vld [vmem:[#allocation5 + $0x40] sm:$0xff]  ;;  %v71_v12 = vld [vmem:[#allocation5 + $0x38] sm:$0xff]  ;;  %v70_v13 = vld [vmem:[#allocation5 + $0x30] sm:$0xff] }
  0x2a   :  { %344 = vmatprep.subr.mxu0 %v77_v2  ;;  %376 = vmatpush3.msra.mxu1 %v187_v6  ;;  %v69_v14 = vld [vmem:[#allocation5 + $0x28] sm:$0xff]  ;;  %v68_v15 = vld [vmem:[#allocation5 + $0x20] sm:$0xff]  ;;  %v67_v16 = vld [vmem:[#allocation5 + $0x18] sm:$0xff] }
  0x2b   :  { %345 = vmatpush3.msra.mxu0 %v77_v2  ;;  %377 = vmatprep.subr.mxu1 %v186_v7  ;;  %v66_v17 = vld [vmem:[#allocation5 + $0x10] sm:$0xff]  ;;  %v65_v18 = vld [vmem:[#allocation5 + $0x8] sm:$0xff]  ;;  %v64_v19 = vld [vmem:[#allocation5] sm:$0xff] }
  0x2c   :  { %346 = vmatprep.subr.mxu0 %v76_v3  ;;  %378 = vmatpush3.msra.mxu1 %v186_v7  ;;  %v63_v20 = vld [vmem:[#allocation2 + $0x8] sm:$0xff]  ;;  %v184_v21 = vld [vmem:[#allocation7 + $0x60] sm:$0xff]  ;;  %v182_v23 = vld [vmem:[#allocation7 + $0x50] sm:$0xff] }
  0x2d   :  { %347 = vmatpush3.msra.mxu0 %v76_v3  ;;  %379 = vmatprep.subr.mxu1 %v185_v9  ;;  %v183_v22 = vld [vmem:[#allocation7 + $0x58] sm:$0xff]  ;;  %v181_v24 = vld [vmem:[#allocation7 + $0x48] sm:$0xff]  ;;  %v180_v25 = vld [vmem:[#allocation7 + $0x40] sm:$0xff] }
  0x2e   :  { %348 = vmatprep.subr.mxu0 %v75_v5  ;;  %380 = vmatpush3.msra.mxu1 %v185_v9  ;;  %v179_v26 = vld [vmem:[#allocation7 + $0x38] sm:$0xff]  ;;  %v178_v27 = vld [vmem:[#allocation7 + $0x30] sm:$0xff]  ;;  %v177_v28 = vld [vmem:[#allocation7 + $0x28] sm:$0xff] }
  0x2f   :  { %349 = vmatpush3.msra.mxu0 %v75_v5  ;;  %381 = vmatprep.subr.mxu1 %v184_v21  ;;  %v176_v29 = vld [vmem:[#allocation7 + $0x20] sm:$0xff]  ;;  %v175_v30 = vld [vmem:[#allocation7 + $0x18] sm:$0xff]  ;;  %v174_v31 = vld [vmem:[#allocation7 + $0x10] sm:$0xff] }
  0x30   :  { %350 = vmatprep.subr.mxu0 %v74_v8  ;;  %382 = vmatpush3.msra.mxu1 %v184_v21  ;;  %v173_v32 = vld [vmem:[#allocation7 + $0x8] sm:$0xff]  ;;  %v172_v33 = vld [vmem:[#allocation7] sm:$0xff]  ;;  %v302_v34 = vld [vmem:[%s578_s2] ss:$0 sm:$0xff] }
  0x31   :  { %351 = vmatpush3.msra.mxu0 %v74_v8  ;;  %383 = vmatprep.subr.mxu1 %v183_v22  ;;  %v303_v50 = vld [vmem:[%s580_s4] ss:$0 sm:$0xff]  ;;  %s484_s4 = scalar_lea.vmem %s290_s11, 256 }
  0x32   :  { %352 = vmatprep.subr.mxu0 %v73_v10  ;;  %384 = vmatpush3.msra.mxu1 %v183_v22  ;;  %p485_p1 = scmp.ne.s32.totalorder %s290_s11, %s484_s4  ;;  %p490_p3 = scmp.lt.s32.totalorder %s484_s4, %s484_s4 }
  0x33   :  { %353 = vmatpush3.msra.mxu0 %v73_v10  ;;  %385 = vmatprep.subr.mxu1 %v182_v23 }
  0x34   :  { %354 = vmatprep.subr.mxu0 %v72_v11  ;;  %386 = vmatpush3.msra.mxu1 %v182_v23  ;;  %p491_p4 = por %p490_p3, %p489_p2 }
  0x35   :  { %355 = vmatpush3.msra.mxu0 %v72_v11  ;;  %387 = vmatprep.subr.mxu1 %v181_v24 }
  0x36   :  { %356 = vmatprep.subr.mxu0 %v71_v12  ;;  %388 = vmatpush3.msra.mxu1 %v181_v24  ;;  %p492_p5 = pnand %p491_p4, %p485_p1 }
  0x37   :  { %357 = vmatpush3.msra.mxu0 %v71_v12  ;;  %389 = vmatprep.subr.mxu1 %v180_v25 }
  0x38   :  { %358 = vmatprep.subr.mxu0 %v70_v13  ;;  %390 = vmatpush3.msra.mxu1 %v180_v25 }
  0x39   :  { %359 = vmatpush3.msra.mxu0 %v70_v13  ;;  %391 = vmatprep.subr.mxu1 %v179_v26 }
  0x3a   :  { %360 = vmatprep.subr.mxu0 %v69_v14  ;;  %392 = vmatpush3.msra.mxu1 %v179_v26 }
  0x3b   :  { %361 = vmatpush3.msra.mxu0 %v69_v14  ;;  %393 = vmatprep.subr.mxu1 %v178_v27 }
  0x3c   :  { %362 = vmatprep.subr.mxu0 %v68_v15  ;;  %394 = vmatpush3.msra.mxu1 %v178_v27 }
  0x3d   :  { %363 = vmatpush3.msra.mxu0 %v68_v15  ;;  %395 = vmatprep.subr.mxu1 %v177_v28 }
  0x3e   :  { %364 = vmatprep.subr.mxu0 %v67_v16  ;;  %396 = vmatpush3.msra.mxu1 %v177_v28 }
  0x3f   :  { %365 = vmatpush3.msra.mxu0 %v67_v16  ;;  %397 = vmatprep.subr.mxu1 %v176_v29 }
  0x40   :  { %366 = vmatprep.subr.mxu0 %v66_v17  ;;  %398 = vmatpush3.msra.mxu1 %v176_v29 }
  0x41   :  { %367 = vmatpush3.msra.mxu0 %v66_v17  ;;  %399 = vmatprep.subr.mxu1 %v175_v30 }
  0x42   :  { %368 = vmatprep.subr.mxu0 %v65_v18  ;;  %400 = vmatpush3.msra.mxu1 %v175_v30 }
  0x43   :  { %369 = vmatpush3.msra.mxu0 %v65_v18  ;;  %401 = vmatprep.subr.mxu1 %v174_v31 }
  0x44   :  { %370 = vmatprep.subr.mxu0 %v64_v19  ;;  %402 = vmatpush3.msra.mxu1 %v174_v31 }
  0x45   :  { %371 = vmatpush3.msra.mxu0 %v64_v19  ;;  %403 = vmatprep.subr.mxu1 %v173_v32 }
  0x46   :  { %373 = vmatmul.mubr.f32.vlgmr.msra.gmra.mxu0 %v63_v20  ;;  %404 = vmatpush3.msra.mxu1 %v173_v32 }
  0x47   :  { %405 = vmatprep.subr.mxu1 %v172_v33 }
  0x48   :  { %406 = vmatpush3.msra.mxu1 %v172_v33 }
 0x106   :  { %v374_v35 = vpop.f32.mrf.mxu0 }
 0x107   :  { %v159_v36 = vadd.f32 %v374_v35, %v302_v34 }
 0x108   :  { %v153_v37 = vpop.f32.mrf.mxu0 }
 0x109   :  { %v165_v38 = vmul.f32 0.70710677, %v159_v36  ;;  %v154_v39 = vadd.f32 %v302_v34, %v153_v37  ;;  %v163_v46 = vmul.f32 0.5, %v159_v36 }
 0x10b   :  { %416 = verf.f32 %v165_v38  ;;  %v164_v40 = vmul.f32 0.70710677, %v154_v39  ;;  %v162_v44 = vmul.f32 0.5, %v154_v39 }
 0x10d   :  { %418 = verf.f32 %v164_v40 }
 0x118   :  { %v417_v41 = vpop.eup %416 }
 0x119   :  { %v169_v43 = vadd.f32 1.0, %v417_v41 }
 0x11a   :  { %v419_v42 = vpop.eup %418 }
 0x11b   :  { %v168_v45 = vadd.f32 1.0, %v419_v42  ;;  %v171_v48 = vmul.f32 %v169_v43, %v163_v46 }
 0x11d   :  { %v170_v47 = vmul.f32 %v168_v45, %v162_v44 }
 0x11f   :  { %407 = vmatprep.mubr.f32.mxu1 %v170_v47 }
 0x120   :  { %408 = vmatmul.mubr.f32.vlgmr.msra.gmra.mxu1 %v171_v48 }
 0x1e0   :  { %v409_v49 = vpop.f32.mrf.mxu1 }
 0x1e1   :  { %v267_v53 = vadd.f32 %v409_v49, %v303_v50 }
 0x1e2   :  { %v261_v51 = vpop.f32.mrf.mxu1 }
 0x1e3   :  { %v262_v52 = vadd.f32 %v303_v50, %v261_v51  ;;  %v271_v55 = vmul.f32 %v267_v53, %v267_v53 }
 0x1e5   :  { %v270_v54 = vmul.f32 %v262_v52, %v262_v52 }
 0x1e7   :  { %272 = vadd.xlane.f32.xlu0 %v270_v54 }
 0x1eb   :  { %274 = vadd.xlane.f32.xlu0 %v271_v55 }
 0x270   :  { %v273_v56 = vpop.xlane.xlu0 %272 }
 0x271   :  { %v276_v57 = vmax.f32 %v273_v56, 1e-24 }
 0x273   :  { %420 = vrsqrt.f32 %v276_v57 }
 0x274   :  { %v275_v58 = vpop.xlane.xlu0 %274 }
 0x275   :  { %v277_v59 = vmax.f32 %v275_v58, 1e-24 }
 0x277   :  { %422 = vrsqrt.f32 %v277_v59 }
 0x280   :  { %v421_v60 = vpop.eup %420 }
 0x281   :  { %v280_v61 = vmul.f32 %v421_v60, %v262_v52 }
 0x283   :  { %282 = vst [vmem:[#allocation8] sm:$0xff] %v280_v61 }
 0x284   :  { %v423_v62 = vpop.eup %422 }
 0x285   :  { %v281_v63 = vmul.f32 %v423_v62, %v267_v53 }
 0x287   :  { %283 = vst [vmem:[#allocation8 + $0x8] sm:$0xff] %v281_v63 }
 0x288   :  { %495 = shalt.err (!%p492_p5)
}
 0x289   :  { %295 = dma.vmem_to_hbm [thread:$0]  %s290_s11, 256, %s581_s5, [#allocation4], %s512_s23, %s512_s23, %s513_s24  }
 0x28a   :  { %508 = dma.done.wait [#allocation4], 256  }
 0x28b   :  { %509 = vsyncadd [#allocation4], 4294967040 }
 0x28c   :  { %299 = vsyncpa [#allocation3], 1 }
 0x28d   :  { %300 = vsyncpa [#allocation6], 1 }
 0x28e   :  { %301 = vsyncpa [#allocation4], 1 }

// kernel: tpu_custom_call.1
= control target key start
LH: loop header
LB: loop body
LE: loop exit
PB: predicated region body
PF: predicated region fallthrough
CT: control target
= control target key end

     0   :  { %10 = vsyncpa [#allocation3], 0  ;;  %s576_s0 = inlined_call_operand.hbm [shape: f32[16,128], index: 0, kind: input, shape index: {}]   ;;  %s577_s1 = inlined_call_operand.hbm [shape: f32[128,128], index: 1, kind: input, shape index: {}]   ;;  %s578_s2 = inlined_call_operand.vmem [shape: f32[1,128], index: 2, kind: input, shape index: {}]   ;;  %s579_s3 = inlined_call_operand.hbm [shape: f32[128,128], index: 3, kind: input, shape index: {}]   ;;  %s580_s4 = inlined_call_operand.vmem [shape: f32[1,128], index: 4, kind: input, shape index: {}]   ;;  %s581_s5 = inlined_call_operand.hbm [shape: f32[16,128], index: 5, kind: output, shape index: {}]  }
   0x1   :  { %11 = vsyncpa [#allocation6], 0 }
   0x2   :  { %12 = vsyncpa [#allocation4], 0  ;;  %s510_s18 = smov [#allocation5]   ;;  %s511_s20 = smov [#allocation2]  }
   0x3   :  { %s30_s19 = sshll.u32 %s510_s18, 4  ;;  %s18_s21 = sshll.u32 %s511_s20, 4  ;;  %s31_s19 = int_to_ptr.vmem [resolvable:$true] %s30_s19  ;;  %s19_s21 = int_to_ptr.vmem [resolvable:$true] %s18_s21 }
   0x4   :  { %s432_s22 = scalar_lea.vmem %s31_s19, 2048  ;;  %p437_p1 = scmp.lt.s32.totalorder %s31_s19, %s31_s19 }
   0x5   :  { %p433_p0 = scmp.ne.s32.totalorder %s31_s19, %s432_s22  ;;  %p438_p2 = scmp.lt.s32.totalorder %s432_s22, %s432_s22 }
   0x7   :  { %p439_p3 = por %p438_p2, %p437_p1 }
   0x9   :  { %p440_p4 = pnand %p439_p3, %p433_p0 }
   0xb   :  { %443 = shalt.err (!%p440_p4)
}
   0xc   :  { %s512_s23 = smov 128   ;;  %s513_s24 = smov 8  }
   0xd   :  { %36 = dma.hbm_to_vmem [thread:$0]  %s577_s1, 2048, %s31_s19, [#allocation6], %s512_s23, %s512_s23, %s513_s24  }
   0xe   :  { %s452_s27 = scalar_lea.vmem %s19_s21, 256  ;;  %p457_p6 = scmp.lt.s32.totalorder %s19_s21, %s19_s21 }
   0xf   :  { %p453_p5 = scmp.ne.s32.totalorder %s19_s21, %s452_s27  ;;  %p458_p7 = scmp.lt.s32.totalorder %s452_s27, %s452_s27 }
  0x11   :  { %p459_p8 = por %p458_p7, %p457_p6 }
  0x13   :  { %p460_p9 = pnand %p459_p8, %p453_p5 }
  0x15   :  { %463 = shalt.err (!%p460_p9)
}
  0x16   :  { %24 = dma.hbm_to_vmem [thread:$0]  %s576_s0, 256, %s19_s21, [#allocation3], %s512_s23, %s512_s23, %s513_s24  }
  0x17   :  { %s514_s30 = smov [#allocation7]  }
  0x18   :  { %s44_s6 = sshll.u32 %s514_s30, 4  ;;  %s45_s6 = int_to_ptr.vmem [resolvable:$true] %s44_s6 }
  0x19   :  { %s472_s7 = scalar_lea.vmem %s45_s6, 2048  ;;  %p477_p11 = scmp.lt.s32.totalorder %s45_s6, %s45_s6 }
  0x1a   :  { %p473_p10 = scmp.ne.s32.totalorder %s45_s6, %s472_s7  ;;  %p478_p12 = scmp.lt.s32.totalorder %s472_s7, %s472_s7 }
  0x1c   :  { %p479_p13 = por %p478_p12, %p477_p11 }
  0x1e   :  { %p480_p0 = pnand %p479_p13, %p473_p10 }
  0x20   :  { %483 = shalt.err (!%p480_p0)
}
  0x21   :  { %50 = dma.hbm_to_vmem [thread:$0]  %s579_s3, 2048, %s45_s6, [#allocation6], %s512_s23, %s512_s23, %s513_s24  }
  0x22   :  { %504 = dma.done.wait [#allocation3], 256  }
  0x23   :  { %505 = vsyncadd [#allocation3], 4294967040 }
  0x24   :  { %506 = dma.done.wait [#allocation6], 4096  }
  0x25   :  { %507 = vsyncadd [#allocation6], 4294963200  ;;  %v79_v0 = vld [vmem:[#allocation5 + $0x78] sm:$0xff]  ;;  %v78_v1 = vld [vmem:[#allocation5 + $0x70] sm:$0xff]  ;;  %s515_s10 = smov [#allocation8]  }
  0x26   :  { %340 = vmatprep.subr.mxu0 %v79_v0  ;;  %v77_v2 = vld [vmem:[#allocation5 + $0x68] sm:$0xff]  ;;  %v76_v3 = vld [vmem:[#allocation5 + $0x60] sm:$0xff]  ;;  %v62_v4 = vld [vmem:[#allocation2] sm:$0xff]  ;;  %s289_s11 = sshll.u32 %s515_s10, 4  ;;  %s290_s11 = int_to_ptr.vmem [resolvable:$true] %s289_s11 }
  0x27   :  { %341 = vmatpush3.msra.mxu0 %v79_v0  ;;  %v75_v5 = vld [vmem:[#allocation5 + $0x58] sm:$0xff]  ;;  %372 = vmatprep.mubr.f32.mxu0 %v62_v4  ;;  %v186_v7 = vld [vmem:[#allocation7 + $0x70] sm:$0xff]  ;;  %v185_v9 = vld [vmem:[#allocation7 + $0x68] sm:$0xff]  ;;  %p489_p2 = scmp.lt.s32.totalorder %s290_s11, %s290_s11 }
  0x28   :  { %342 = vmatprep.subr.mxu0 %v78_v1  ;;  %v187_v6 = vld [vmem:[#allocation7 + $0x78] sm:$0xff]  ;;  %v74_v8 = vld [vmem:[#allocation5 + $0x50] sm:$0xff]  ;;  %v73_v10 = vld [vmem:[#allocation5 + $0x48] sm:$0xff] }
  0x29   :  { %343 = vmatpush3.msra.mxu0 %v78_v1  ;;  %375 = vmatprep.subr.mxu1 %v187_v6  ;;  %v72_v11 = vld [vmem:[#allocation5 + $0x40] sm:$0xff]  ;;  %v71_v12 = vld [vmem:[#allocation5 + $0x38] sm:$0xff]  ;;  %v70_v13 = vld [vmem:[#allocation5 + $0x30] sm:$0xff] }
  0x2a   :  { %344 = vmatprep.subr.mxu0 %v77_v2  ;;  %376 = vmatpush3.msra.mxu1 %v187_v6  ;;  %v69_v14 = vld [vmem:[#allocation5 + $0x28] sm:$0xff]  ;;  %v68_v15 = vld [vmem:[#allocation5 + $0x20] sm:$0xff]  ;;  %v67_v16 = vld [vmem:[#allocation5 + $0x18] sm:$0xff] }
  0x2b   :  { %345 = vmatpush3.msra.mxu0 %v77_v2  ;;  %377 = vmatprep.subr.mxu1 %v186_v7  ;;  %v66_v17 = vld [vmem:[#allocation5 + $0x10] sm:$0xff]  ;;  %v65_v18 = vld [vmem:[#allocation5 + $0x8] sm:$0xff]  ;;  %v64_v19 = vld [vmem:[#allocation5] sm:$0xff] }
  0x2c   :  { %346 = vmatprep.subr.mxu0 %v76_v3  ;;  %378 = vmatpush3.msra.mxu1 %v186_v7  ;;  %v63_v20 = vld [vmem:[#allocation2 + $0x8] sm:$0xff]  ;;  %v184_v21 = vld [vmem:[#allocation7 + $0x60] sm:$0xff]  ;;  %v182_v23 = vld [vmem:[#allocation7 + $0x50] sm:$0xff] }
  0x2d   :  { %347 = vmatpush3.msra.mxu0 %v76_v3  ;;  %379 = vmatprep.subr.mxu1 %v185_v9  ;;  %v183_v22 = vld [vmem:[#allocation7 + $0x58] sm:$0xff]  ;;  %v181_v24 = vld [vmem:[#allocation7 + $0x48] sm:$0xff]  ;;  %v180_v25 = vld [vmem:[#allocation7 + $0x40] sm:$0xff] }
  0x2e   :  { %348 = vmatprep.subr.mxu0 %v75_v5  ;;  %380 = vmatpush3.msra.mxu1 %v185_v9  ;;  %v179_v26 = vld [vmem:[#allocation7 + $0x38] sm:$0xff]  ;;  %v178_v27 = vld [vmem:[#allocation7 + $0x30] sm:$0xff]  ;;  %v177_v28 = vld [vmem:[#allocation7 + $0x28] sm:$0xff] }
  0x2f   :  { %349 = vmatpush3.msra.mxu0 %v75_v5  ;;  %381 = vmatprep.subr.mxu1 %v184_v21  ;;  %v176_v29 = vld [vmem:[#allocation7 + $0x20] sm:$0xff]  ;;  %v175_v30 = vld [vmem:[#allocation7 + $0x18] sm:$0xff]  ;;  %v174_v31 = vld [vmem:[#allocation7 + $0x10] sm:$0xff] }
  0x30   :  { %350 = vmatprep.subr.mxu0 %v74_v8  ;;  %382 = vmatpush3.msra.mxu1 %v184_v21  ;;  %v173_v32 = vld [vmem:[#allocation7 + $0x8] sm:$0xff]  ;;  %v172_v33 = vld [vmem:[#allocation7] sm:$0xff]  ;;  %v302_v34 = vld [vmem:[%s578_s2] ss:$0 sm:$0xff] }
  0x31   :  { %351 = vmatpush3.msra.mxu0 %v74_v8  ;;  %383 = vmatprep.subr.mxu1 %v183_v22  ;;  %v303_v50 = vld [vmem:[%s580_s4] ss:$0 sm:$0xff]  ;;  %s484_s4 = scalar_lea.vmem %s290_s11, 256 }
  0x32   :  { %352 = vmatprep.subr.mxu0 %v73_v10  ;;  %384 = vmatpush3.msra.mxu1 %v183_v22  ;;  %p485_p1 = scmp.ne.s32.totalorder %s290_s11, %s484_s4  ;;  %p490_p3 = scmp.lt.s32.totalorder %s484_s4, %s484_s4 }
  0x33   :  { %353 = vmatpush3.msra.mxu0 %v73_v10  ;;  %385 = vmatprep.subr.mxu1 %v182_v23 }
  0x34   :  { %354 = vmatprep.subr.mxu0 %v72_v11  ;;  %386 = vmatpush3.msra.mxu1 %v182_v23  ;;  %p491_p4 = por %p490_p3, %p489_p2 }
  0x35   :  { %355 = vmatpush3.msra.mxu0 %v72_v11  ;;  %387 = vmatprep.subr.mxu1 %v181_v24 }
  0x36   :  { %356 = vmatprep.subr.mxu0 %v71_v12  ;;  %388 = vmatpush3.msra.mxu1 %v181_v24  ;;  %p492_p5 = pnand %p491_p4, %p485_p1 }
  0x37   :  { %357 = vmatpush3.msra.mxu0 %v71_v12  ;;  %389 = vmatprep.subr.mxu1 %v180_v25 }
  0x38   :  { %358 = vmatprep.subr.mxu0 %v70_v13  ;;  %390 = vmatpush3.msra.mxu1 %v180_v25 }
  0x39   :  { %359 = vmatpush3.msra.mxu0 %v70_v13  ;;  %391 = vmatprep.subr.mxu1 %v179_v26 }
  0x3a   :  { %360 = vmatprep.subr.mxu0 %v69_v14  ;;  %392 = vmatpush3.msra.mxu1 %v179_v26 }
  0x3b   :  { %361 = vmatpush3.msra.mxu0 %v69_v14  ;;  %393 = vmatprep.subr.mxu1 %v178_v27 }
  0x3c   :  { %362 = vmatprep.subr.mxu0 %v68_v15  ;;  %394 = vmatpush3.msra.mxu1 %v178_v27 }
  0x3d   :  { %363 = vmatpush3.msra.mxu0 %v68_v15  ;;  %395 = vmatprep.subr.mxu1 %v177_v28 }
  0x3e   :  { %364 = vmatprep.subr.mxu0 %v67_v16  ;;  %396 = vmatpush3.msra.mxu1 %v177_v28 }
  0x3f   :  { %365 = vmatpush3.msra.mxu0 %v67_v16  ;;  %397 = vmatprep.subr.mxu1 %v176_v29 }
  0x40   :  { %366 = vmatprep.subr.mxu0 %v66_v17  ;;  %398 = vmatpush3.msra.mxu1 %v176_v29 }
  0x41   :  { %367 = vmatpush3.msra.mxu0 %v66_v17  ;;  %399 = vmatprep.subr.mxu1 %v175_v30 }
  0x42   :  { %368 = vmatprep.subr.mxu0 %v65_v18  ;;  %400 = vmatpush3.msra.mxu1 %v175_v30 }
  0x43   :  { %369 = vmatpush3.msra.mxu0 %v65_v18  ;;  %401 = vmatprep.subr.mxu1 %v174_v31 }
  0x44   :  { %370 = vmatprep.subr.mxu0 %v64_v19  ;;  %402 = vmatpush3.msra.mxu1 %v174_v31 }
  0x45   :  { %371 = vmatpush3.msra.mxu0 %v64_v19  ;;  %403 = vmatprep.subr.mxu1 %v173_v32 }
  0x46   :  { %373 = vmatmul.mubr.f32.vlgmr.msra.gmra.mxu0 %v63_v20  ;;  %404 = vmatpush3.msra.mxu1 %v173_v32 }
  0x47   :  { %405 = vmatprep.subr.mxu1 %v172_v33 }
  0x48   :  { %406 = vmatpush3.msra.mxu1 %v172_v33 }
 0x106   :  { %v374_v35 = vpop.f32.mrf.mxu0 }
 0x107   :  { %v159_v36 = vadd.f32 %v374_v35, %v302_v34 }
 0x108   :  { %v153_v37 = vpop.f32.mrf.mxu0 }
 0x109   :  { %v165_v38 = vmul.f32 0.70710677, %v159_v36  ;;  %v154_v39 = vadd.f32 %v302_v34, %v153_v37  ;;  %v163_v46 = vmul.f32 0.5, %v159_v36 }
 0x10b   :  { %416 = verf.f32 %v165_v38  ;;  %v164_v40 = vmul.f32 0.70710677, %v154_v39  ;;  %v162_v44 = vmul.f32 0.5, %v154_v39 }
 0x10d   :  { %418 = verf.f32 %v164_v40 }
 0x118   :  { %v417_v41 = vpop.eup %416 }
 0x119   :  { %v169_v43 = vadd.f32 1.0, %v417_v41 }
 0x11a   :  { %v419_v42 = vpop.eup %418 }
 0x11b   :  { %v168_v45 = vadd.f32 1.0, %v419_v42  ;;  %v171_v48 = vmul.f32 %v169_v43, %v163_v46 }
 0x11d   :  { %v170_v47 = vmul.f32 %v168_v45, %v162_v44 }
 0x11f   :  { %407 = vmatprep.mubr.f32.mxu1 %v170_v47 }
 0x120   :  { %408 = vmatmul.mubr.f32.vlgmr.msra.gmra.mxu1 %v171_v48 }
 0x1e0   :  { %v409_v49 = vpop.f32.mrf.mxu1 }
 0x1e1   :  { %v267_v53 = vadd.f32 %v409_v49, %v303_v50 }
 0x1e2   :  { %v261_v51 = vpop.f32.mrf.mxu1 }
 0x1e3   :  { %v262_v52 = vadd.f32 %v303_v50, %v261_v51  ;;  %v271_v55 = vmul.f32 %v267_v53, %v267_v53 }
 0x1e5   :  { %v270_v54 = vmul.f32 %v262_v52, %v262_v52 }
 0x1e7   :  { %272 = vadd.xlane.f32.xlu0 %v270_v54 }
 0x1eb   :  { %274 = vadd.xlane.f32.xlu0 %v271_v55 }
 0x270   :  { %v273_v56 = vpop.xlane.xlu0 %272 }
 0x271   :  { %v276_v57 = vmax.f32 %v273_v56, 1e-24 }
 0x273   :  { %420 = vrsqrt.f32 %v276_v57 }
 0x274   :  { %v275_v58 = vpop.xlane.xlu0 %274 }
 0x275   :  { %v277_v59 = vmax.f32 %v275_v58, 1e-24 }
 0x277   :  { %422 = vrsqrt.f32 %v277_v59 }
 0x280   :  { %v421_v60 = vpop.eup %420 }
 0x281   :  { %v280_v61 = vmul.f32 %v421_v60, %v262_v52 }
 0x283   :  { %282 = vst [vmem:[#allocation8] sm:$0xff] %v280_v61 }
 0x284   :  { %v423_v62 = vpop.eup %422 }
 0x285   :  { %v281_v63 = vmul.f32 %v423_v62, %v267_v53 }
 0x287   :  { %283 = vst [vmem:[#allocation8 + $0x8] sm:$0xff] %v281_v63 }
 0x288   :  { %495 = shalt.err (!%p492_p5)
}
 0x289   :  { %295 = dma.vmem_to_hbm [thread:$0]  %s290_s11, 256, %s581_s5, [#allocation4], %s512_s23, %s512_s23, %s513_s24  }
 0x28a   :  { %508 = dma.done.wait [#allocation4], 256  }
 0x28b   :  { %509 = vsyncadd [#allocation4], 4294967040 }
 0x28c   :  { %299 = vsyncpa [#allocation3], 1 }
 0x28d   :  { %300 = vsyncpa [#allocation6], 1 }
 0x28e   :  { %301 = vsyncpa [#allocation4], 1 }

</bundles_post_ra>
